<compile_context>
chip_gen: v7x
topology: tpu7x:2x2x1
jax: 0.10.0
libtpu: 0.0.40
codegen_flags: <defaults>
</compile_context>

<pallas_src>
import functools

import jax
import jax.numpy as jnp
from jax import lax
from jax.experimental import pallas as pl
from jax.experimental.pallas import tpu as pltpu

_LANE = 128
_SUBLANE = 8


def _round_up(n, m):
    return ((n + m - 1) // m) * m


def _mlp_softmax_kernel(x_ref, w1_ref, b1_ref, w2_ref, b2_ref, out_ref, *,
                        out_dim, include_softmax, use_bf16):
    x = x_ref[...]
    w1 = w1_ref[...]
    w2 = w2_ref[...]
    if use_bf16:
        # MXU runs bf16 at full rate on all generations; keep f32 accumulate.
        x = x.astype(jnp.bfloat16)
        w1 = w1.astype(jnp.bfloat16)
        w2 = w2.astype(jnp.bfloat16)

    # Layer 1: linear + ReLU (MXU matmul, f32 accumulate; epilogue in f32).
    h = jnp.dot(x, w1, preferred_element_type=jnp.float32)
    h = jnp.maximum(h + b1_ref[...], 0.0)
    h_mm = h.astype(jnp.bfloat16) if use_bf16 else h

    # Layer 2: linear.
    logits = jnp.dot(h_mm, w2, preferred_element_type=jnp.float32) + b2_ref[...]

    if include_softmax:
        # Exclude zero-padded output lanes from the softmax max/sum.
        lane = lax.broadcasted_iota(jnp.int32, logits.shape, dimension=1)
        logits = jnp.where(lane < out_dim, logits, -1e30)
        m = jnp.max(logits, axis=-1, keepdims=True)
        e = jnp.exp(logits - m)
        denom = jnp.sum(e, axis=-1, keepdims=True)
        # EUP approximate reciprocal + one Newton step -> ~f32-exact, no VPU divide.
        inv = pl.reciprocal(denom, approx=True)
        inv = inv * (2.0 - denom * inv)
        out = e * inv
    else:
        out = logits

    out_ref[...] = out.astype(out_ref.dtype)


def prepare_params(w1, b1, w2, b2):
    """One-time parameter preprocessing (do NOT call per forward).

    w1: [in_dim, hidden] (pre-transposed from PyTorch's [hidden, in_dim])
    b1: [hidden]
    w2: [hidden, out]
    b2: [out]
    Zero-pads every feature dim up to a multiple of 128 lanes.
    """
    in_dim, hidden = w1.shape
    out_dim = w2.shape[1]
    kp = _round_up(in_dim, _LANE)
    hp = _round_up(hidden, _LANE)
    op = _round_up(out_dim, _LANE)

    w1p = jnp.zeros((kp, hp), jnp.float32).at[:in_dim, :hidden].set(w1.astype(jnp.float32))
    b1p = jnp.zeros((1, hp), jnp.float32).at[0, :hidden].set(b1.reshape(-1).astype(jnp.float32))
    w2p = jnp.zeros((hp, op), jnp.float32).at[:hidden, :out_dim].set(w2.astype(jnp.float32))
    b2p = jnp.zeros((1, op), jnp.float32).at[0, :out_dim].set(b2.reshape(-1).astype(jnp.float32))
    return (w1p, b1p, w2p, b2p), (in_dim, hidden, out_dim)


def neural_net_forward(x, padded_params, dims, *, include_softmax=True,
                       tile_b=256, use_bf16=False):
    """x: [B, in_dim] float -> probs [B, out_dim] (or logits if include_softmax=False)."""
    w1p, b1p, w2p, b2p = padded_params
    in_dim, hidden, out_dim = dims
    kp, hp = w1p.shape
    op = w2p.shape[1]

    B = x.shape[0]
    # Batch tile: multiple of 8 sublanes, no bigger than the (padded) batch.
    tile_b = _round_up(max(_SUBLANE, min(tile_b, _round_up(B, _SUBLANE))), _SUBLANE)
    B_pad = _round_up(B, tile_b)

    xp = jnp.zeros((B_pad, kp), jnp.float32).at[:B, :in_dim].set(x.astype(jnp.float32))

    kernel = functools.partial(
        _mlp_softmax_kernel,
        out_dim=out_dim,
        include_softmax=include_softmax,
        use_bf16=use_bf16,
    )

    out_padded = pl.pallas_call(
        kernel,
        out_shape=jax.ShapeDtypeStruct((B_pad, op), jnp.float32),
        grid=(B_pad // tile_b,),
        in_specs=[
            pl.BlockSpec((tile_b, kp), lambda i: (i, 0)),   # x streams per tile
            pl.BlockSpec((kp, hp), lambda i: (0, 0)),       # weights resident in VMEM
            pl.BlockSpec((1, hp), lambda i: (0, 0)),
            pl.BlockSpec((hp, op), lambda i: (0, 0)),
            pl.BlockSpec((1, op), lambda i: (0, 0)),
        ],
        out_specs=pl.BlockSpec((tile_b, op), lambda i: (i, 0)),  # 128-wide lane-dense store
        compiler_params=pltpu.CompilerParams(
            dimension_semantics=("parallel",)),
    )(xp, w1p, b1p, w2p, b2p)

    return out_padded[:B, :out_dim]


def reference_forward(x, w1, b1, w2, b2, include_softmax=True):
    h = jnp.maximum(x @ w1 + b1.reshape(1, -1), 0.0)
    logits = h @ w2 + b2.reshape(1, -1)
    if include_softmax:
        return jax.nn.softmax(logits, axis=-1)
    return logits


if __name__ == "__main__":
    # Shapes consistent with the module: in_dim=32, hidden=64, out_dim=16.
    IN_DIM, HIDDEN, OUT_DIM = 32, 64, 16

    key = jax.random.PRNGKey(0)
    kx, kw1, kb1, kw2, kb2, kx2 = jax.random.split(key, 6)

    bound1 = 1.0 / (IN_DIM ** 0.5)
    bound2 = 1.0 / (HIDDEN ** 0.5)
    # Stored pre-transposed: [in_dim, hidden] / [hidden, out]; biases 1-D like nn.Linear.
    w1 = jax.random.uniform(kw1, (IN_DIM, HIDDEN), minval=-bound1, maxval=bound1, dtype=jnp.float32)
    b1 = jax.random.uniform(kb1, (HIDDEN,), minval=-bound1, maxval=bound1, dtype=jnp.float32)
    w2 = jax.random.uniform(kw2, (HIDDEN, OUT_DIM), minval=-bound2, maxval=bound2, dtype=jnp.float32)
    b2 = jax.random.uniform(kb2, (OUT_DIM,), minval=-bound2, maxval=bound2, dtype=jnp.float32)

    # One-time parameter padding (amortized across all forward calls).
    padded_params, dims = prepare_params(w1, b1, w2, b2)

    # Case 1: tiny batch (B=8), single grid point.
    x = jax.random.normal(kx, (8, IN_DIM), dtype=jnp.float32)
    out = jax.block_until_ready(neural_net_forward(x, padded_params, dims))
    ref = reference_forward(x, w1, b1, w2, b2)
    assert out.shape == (8, OUT_DIM)
    assert jnp.allclose(out, ref, atol=1e-4, rtol=1e-4), "mismatch vs reference (B=8)"
    assert jnp.allclose(jnp.sum(out, axis=-1), 1.0, atol=1e-4)

    # Case 2: larger batch (B=64) with tile_b=32 -> grid of 2 batch tiles.
    x2 = jax.random.normal(kx2, (64, IN_DIM), dtype=jnp.float32)
    out2 = jax.block_until_ready(
        neural_net_forward(x2, padded_params, dims, tile_b=32))
    ref2 = reference_forward(x2, w1, b1, w2, b2)
    assert out2.shape == (64, OUT_DIM)
    assert jnp.allclose(out2, ref2, atol=1e-4, rtol=1e-4), "mismatch vs reference (B=64)"
    assert jnp.allclose(jnp.sum(out2, axis=-1), 1.0, atol=1e-4)

    print("KERNEL_OK")
</pallas_src>

<mosaic_0001>
module attributes {stable_mosaic.version = 11 : i64} {
  func.func @_mlp_softmax_kernel(%arg0: i32, %arg1: memref<8x128xf32, #tpu.memory_space<vmem>>, %arg2: memref<128x128xf32, #tpu.memory_space<vmem>>, %arg3: memref<1x128xf32, #tpu.memory_space<vmem>>, %arg4: memref<128x128xf32, #tpu.memory_space<vmem>>, %arg5: memref<1x128xf32, #tpu.memory_space<vmem>>, %arg6: memref<8x128xf32, #tpu.memory_space<vmem>>) attributes {dimension_semantics = [#tpu.dimension_semantics<parallel>], iteration_bounds = array<i64: 1>, scalar_prefetch = 0 : i64, scratch_operands = 0 : i64, tpu.core_type = #tpu.core_type<tc>, window_params = [{transform_indices = @transform_0, window_bounds = array<i64: 8, 128>}, {pipeline_mode = #tpu.pipeline_mode<synchronous>, transform_indices = @transform_1, window_bounds = array<i64: 128, 128>}, {pipeline_mode = #tpu.pipeline_mode<synchronous>, transform_indices = @transform_2, window_bounds = array<i64: 1, 128>}, {pipeline_mode = #tpu.pipeline_mode<synchronous>, transform_indices = @transform_3, window_bounds = array<i64: 128, 128>}, {pipeline_mode = #tpu.pipeline_mode<synchronous>, transform_indices = @transform_4, window_bounds = array<i64: 1, 128>}, {transform_indices = @transform_5, window_bounds = array<i64: 8, 128>}]} {
    %c0 = arith.constant 0 : index
    %c0_0 = arith.constant 0 : index
    %0 = vector.load %arg1[%c0, %c0_0] : memref<8x128xf32, #tpu.memory_space<vmem>>, vector<8x128xf32>
    %c0_1 = arith.constant 0 : index
    %c0_2 = arith.constant 0 : index
    %1 = vector.load %arg2[%c0_1, %c0_2] : memref<128x128xf32, #tpu.memory_space<vmem>>, vector<128x128xf32>
    %c0_3 = arith.constant 0 : index
    %c0_4 = arith.constant 0 : index
    %2 = vector.load %arg4[%c0_3, %c0_4] : memref<128x128xf32, #tpu.memory_space<vmem>>, vector<128x128xf32>
    %cst = arith.constant dense<0.000000e+00> : vector<8x128xf32>
    %3 = tpu.matmul %0, %1, %cst {dimension_numbers = #tpu.dot_dimension_numbers<[1], [0], [0], [1], [0, 0, 1, 1], [], []>} : vector<8x128xf32>, vector<128x128xf32>, vector<8x128xf32> -> vector<8x128xf32>
    %c0_5 = arith.constant 0 : index
    %c0_6 = arith.constant 0 : index
    %4 = vector.load %arg3[%c0_5, %c0_6] : memref<1x128xf32, #tpu.memory_space<vmem>>, vector<1x128xf32>
    %5 = vector.broadcast %4 : vector<1x128xf32> to vector<8x128xf32>
    %6 = arith.addf %3, %5 : vector<8x128xf32>
    %cst_7 = arith.constant 0.000000e+00 : f32
    %7 = vector.broadcast %cst_7 : f32 to vector<8x128xf32>
    %8 = arith.maximumf %6, %7 : vector<8x128xf32>
    %cst_8 = arith.constant dense<0.000000e+00> : vector<8x128xf32>
    %9 = tpu.matmul %8, %2, %cst_8 {dimension_numbers = #tpu.dot_dimension_numbers<[1], [0], [0], [1], [0, 0, 1, 1], [], []>} : vector<8x128xf32>, vector<128x128xf32>, vector<8x128xf32> -> vector<8x128xf32>
    %c0_9 = arith.constant 0 : index
    %c0_10 = arith.constant 0 : index
    %10 = vector.load %arg5[%c0_9, %c0_10] : memref<1x128xf32, #tpu.memory_space<vmem>>, vector<1x128xf32>
    %11 = vector.broadcast %10 : vector<1x128xf32> to vector<8x128xf32>
    %12 = arith.addf %9, %11 : vector<8x128xf32>
    %13 = tpu.iota {dimensions = array<i32: 1>} : vector<8x128xi32>
    %c16_i32 = arith.constant 16 : i32
    %14 = vector.broadcast %c16_i32 : i32 to vector<8x128xi32>
    %15 = arith.cmpi slt, %13, %14 : vector<8x128xi32>
    %cst_11 = arith.constant -1.000000e+30 : f32
    %16 = vector.broadcast %cst_11 : f32 to vector<8x128xf32>
    %17 = arith.select %15, %12, %16 : vector<8x128xi1>, vector<8x128xf32>
    %cst_12 = arith.constant dense<0xFF800000> : vector<8xf32>
    %18 = vector.multi_reduction <maximumf>, %17, %cst_12 [1] : vector<8x128xf32> to vector<8xf32>
    %19 = vector.shape_cast %18 : vector<8xf32> to vector<8x1xf32>
    %20 = vector.broadcast %19 : vector<8x1xf32> to vector<8x128xf32>
    %21 = arith.subf %17, %20 : vector<8x128xf32>
    %22 = math.exp %21 : vector<8x128xf32>
    %cst_13 = arith.constant dense<0.000000e+00> : vector<8xf32>
    %23 = vector.multi_reduction <add>, %22, %cst_13 [1] : vector<8x128xf32> to vector<8xf32>
    %24 = vector.shape_cast %23 : vector<8xf32> to vector<8x1xf32>
    %25 = tpu.reciprocal %24 {approx = true} : vector<8x1xf32> -> vector<8x1xf32>
    %26 = arith.mulf %24, %25 : vector<8x1xf32>
    %cst_14 = arith.constant 2.000000e+00 : f32
    %27 = vector.broadcast %cst_14 : f32 to vector<8x1xf32>
    %28 = arith.subf %27, %26 : vector<8x1xf32>
    %29 = arith.mulf %25, %28 : vector<8x1xf32>
    %30 = vector.broadcast %29 : vector<8x1xf32> to vector<8x128xf32>
    %31 = arith.mulf %22, %30 : vector<8x128xf32>
    %c0_15 = arith.constant 0 : index
    %c0_16 = arith.constant 0 : index
    %32 = vector.load %arg6[%c0_15, %c0_16] : memref<8x128xf32, #tpu.memory_space<vmem>>, vector<8x128xf32>
    tpu.vector_store %arg6[%c0_15, %c0_16], %31 {strides = array<i32>} : memref<8x128xf32, #tpu.memory_space<vmem>>, vector<8x128xf32>,
    return
  }
  func.func @transform_0(%arg0: i32) -> (i32, i32) {
    %c0_i32 = arith.constant 0 : i32
    %c0_i32_0 = arith.constant 0 : i32
    return %arg0, %c0_i32 : i32, i32
  }
  func.func @transform_1(%arg0: i32) -> (i32, i32) {
    %c0_i32 = arith.constant 0 : i32
    %c0_i32_0 = arith.constant 0 : i32
    %c0_i32_1 = arith.constant 0 : i32
    return %c0_i32, %c0_i32_0 : i32, i32
  }
  func.func @transform_2(%arg0: i32) -> (i32, i32) {
    %c0_i32 = arith.constant 0 : i32
    %c0_i32_0 = arith.constant 0 : i32
    %c0_i32_1 = arith.constant 0 : i32
    return %c0_i32, %c0_i32_0 : i32, i32
  }
  func.func @transform_3(%arg0: i32) -> (i32, i32) {
    %c0_i32 = arith.constant 0 : i32
    %c0_i32_0 = arith.constant 0 : i32
    %c0_i32_1 = arith.constant 0 : i32
    return %c0_i32, %c0_i32_0 : i32, i32
  }
  func.func @transform_4(%arg0: i32) -> (i32, i32) {
    %c0_i32 = arith.constant 0 : i32
    %c0_i32_0 = arith.constant 0 : i32
    %c0_i32_1 = arith.constant 0 : i32
    return %c0_i32, %c0_i32_0 : i32, i32
  }
  func.func @transform_5(%arg0: i32) -> (i32, i32) {
    %c0_i32 = arith.constant 0 : i32
    %c0_i32_0 = arith.constant 0 : i32
    return %arg0, %c0_i32 : i32, i32
  }
}

</mosaic_0001>

<bundles_post_ra>
// kernel: tpu_custom_call.1
= control target key start
LH: loop header
LB: loop body
LE: loop exit
PB: predicated region body
PF: predicated region fallthrough
CT: control target
= control target key end

     0   :  { %10 = vsyncpa [#allocation3], 0  ;;  %s657_s0 = inlined_call_operand.hbm [shape: f32[8,128], index: 0, kind: input, shape index: {}]   ;;  %s658_s1 = inlined_call_operand.hbm [shape: f32[128,128], index: 1, kind: input, shape index: {}]   ;;  %s659_s2 = inlined_call_operand.vmem [shape: f32[1,128], index: 2, kind: input, shape index: {}]   ;;  %s660_s3 = inlined_call_operand.hbm [shape: f32[128,128], index: 3, kind: input, shape index: {}]   ;;  %s661_s4 = inlined_call_operand.vmem [shape: f32[1,128], index: 4, kind: input, shape index: {}]   ;;  %s662_s5 = inlined_call_operand.hbm [shape: f32[8,128], index: 5, kind: output, shape index: {}]  }
   0x1   :  { %11 = vsyncpa [#allocation6], 0 }
   0x2   :  { %12 = vsyncpa [#allocation4], 0  ;;  %s542_s18 = smov [#allocation5]   ;;  %s448_s22 = scalar_lea.hbm %s658_s1, 2048 }
   0x3   :  { %s28_s19 = sshll.u32 %s542_s18, 4  ;;  %p449_p0 = scmp.ne.s32.totalorder %s658_s1, %s448_s22  ;;  %s29_s19 = int_to_ptr.vmem [resolvable:$true] %s28_s19 }
   0x4   :  { %p452_p1 = scmp.lt.u32.totalorder %s448_s22, %s658_s1 }
   0x6   :  { %p454_p2 = pnand %p452_p1, %p449_p0 }
   0x8   :  { %457 = shalt.err (!%p454_p2)
}
   0x9   :  { %s458_s27 = scalar_lea.vmem %s29_s19, 2048  ;;  %p463_p4 = scmp.lt.s32.totalorder %s29_s19, %s29_s19 }
   0xa   :  { %p459_p3 = scmp.ne.s32.totalorder %s29_s19, %s458_s27  ;;  %p464_p5 = scmp.lt.s32.totalorder %s458_s27, %s458_s27 }
   0xc   :  { %p465_p6 = por %p464_p5, %p463_p4 }
   0xe   :  { %p466_p7 = pnand %p465_p6, %p459_p3 }
  0x10   :  { %469 = shalt.err (!%p466_p7)
}
  0x11   :  { %s543_s28 = smov 128   ;;  %s544_s29 = smov 8  }
  0x12   :  { %34 = dma.hbm_to_vmem [thread:$0]  %s658_s1, 2048, %s29_s19, [#allocation6], %s543_s28, %s543_s28, %s544_s29  }
  0x13   :  { %s545_s7 = smov [#allocation2]   ;;  %s546_s9 = smov [#allocation7]  }
  0x14   :  { %s19_s8 = sshll.u32 %s545_s7, 4  ;;  %s42_s10 = sshll.u32 %s546_s9, 4  ;;  %s20_s8 = int_to_ptr.vmem [resolvable:$true] %s19_s8  ;;  %s43_s10 = int_to_ptr.vmem [resolvable:$true] %s42_s10 }
  0x15   :  { %s470_s13 = scalar_lea.hbm %s657_s0, 128 }
  0x16   :  { %p471_p8 = scmp.ne.s32.totalorder %s657_s0, %s470_s13  ;;  %p474_p9 = scmp.lt.u32.totalorder %s470_s13, %s657_s0 }
  0x18   :  { %p476_p10 = pnand %p474_p9, %p471_p8 }
  0x1a   :  { %479 = shalt.err (!%p476_p10)
}
  0x1b   :  { %s480_s1 = scalar_lea.vmem %s20_s8, 128  ;;  %p485_p12 = scmp.lt.s32.totalorder %s20_s8, %s20_s8 }
  0x1c   :  { %p481_p11 = scmp.ne.s32.totalorder %s20_s8, %s480_s1  ;;  %p486_p13 = scmp.lt.s32.totalorder %s480_s1, %s480_s1 }
  0x1e   :  { %p487_p0 = por %p486_p13, %p485_p12 }
  0x20   :  { %p488_p1 = pnand %p487_p0, %p481_p11 }
  0x22   :  { %491 = shalt.err (!%p488_p1)
}
  0x23   :  { %22 = dma.hbm_to_vmem [thread:$0]  %s657_s0, 128, %s20_s8, [#allocation3]  }
  0x24   :  { %s492_s22 = scalar_lea.hbm %s660_s3, 2048 }
  0x25   :  { %p493_p2 = scmp.ne.s32.totalorder %s660_s3, %s492_s22  ;;  %p496_p3 = scmp.lt.u32.totalorder %s492_s22, %s660_s3 }
  0x27   :  { %p498_p4 = pnand %p496_p3, %p493_p2 }
  0x29   :  { %501 = shalt.err (!%p498_p4)
}
  0x2a   :  { %s502_s27 = scalar_lea.vmem %s43_s10, 2048  ;;  %p507_p6 = scmp.lt.s32.totalorder %s43_s10, %s43_s10 }
  0x2b   :  { %p503_p5 = scmp.ne.s32.totalorder %s43_s10, %s502_s27  ;;  %p508_p7 = scmp.lt.s32.totalorder %s502_s27, %s502_s27 }
  0x2d   :  { %p509_p8 = por %p508_p7, %p507_p6 }
  0x2f   :  { %p510_p9 = pnand %p509_p8, %p503_p5 }
  0x31   :  { %513 = shalt.err (!%p510_p9)
}
  0x32   :  { %48 = dma.hbm_to_vmem [thread:$0]  %s660_s3, 2048, %s43_s10, [#allocation6], %s543_s28, %s543_s28, %s544_s29  }
  0x33   :  { %536 = dma.done.wait [#allocation3], 128  }
  0x34   :  { %537 = vsyncadd [#allocation3], 4294967168 }
  0x35   :  { %538 = dma.done.wait [#allocation6], 4096  }
  0x36   :  { %539 = vsyncadd [#allocation6], 4294963200  ;;  %v547_v0 = vmov 0.0|0.0   ;;  %vm548_vm0 = vmmov 0   ;;  %v549_v1 = vmov 0.0   ;;  %v61_v2 = vld [vmem:[#allocation5] sm:$0xff]  ;;  %v248_v56 = vlaneseq }
  0x37   :  { %387 = vmatprep.subr.bf16.mxu0 %v547_v0  ;;  %349 = vmatprep.mubr.msk.f32.mxu0 %vm548_vm0, %v549_v1  ;;  %v62_v3 = vld [vmem:[#allocation5 + $0x8] sm:$0xff]  ;;  %v63_v4 = vld [vmem:[#allocation5 + $0x10] sm:$0xff]  ;;  %v64_v6 = vld [vmem:[#allocation5 + $0x18] sm:$0xff] }
  0x38   :  { %411 = vmatprep.subr.bf16.mxu1 %v547_v0  ;;  %384 = vmatprep.mubr.msk.f32.mxu1 %vm548_vm0, %v549_v1  ;;  %v388_v5 = vpack.c.bf16 %v62_v3, %v61_v2  ;;  %v391_v7 = vpack.c.bf16 %v64_v6, %v63_v4  ;;  %v65_v8 = vld [vmem:[#allocation5 + $0x20] sm:$0xff]  ;;  %v66_v9 = vld [vmem:[#allocation5 + $0x28] sm:$0xff]  ;;  %v79_v12 = vld [vmem:[#allocation7 + $0x10] sm:$0xff]  ;;  %v249_v57 = vand.u32 127, %v248_v56 }
  0x39   :  { %v77_v10 = vld [vmem:[#allocation7] sm:$0xff]  ;;  %v78_v11 = vld [vmem:[#allocation7 + $0x8] sm:$0xff]  ;;  %v80_v13 = vld [vmem:[#allocation7 + $0x18] sm:$0xff]  ;;  %v394_v14 = vpack.c.bf16 %v66_v9, %v65_v8 }
  0x3a   :  { %389 = vmatpush3.bf16.msra.mxu0 %v388_v5  ;;  %v412_v15 = vpack.c.bf16 %v78_v11, %v77_v10  ;;  %v67_v16 = vld [vmem:[#allocation5 + $0x30] sm:$0xff]  ;;  %v68_v17 = vld [vmem:[#allocation5 + $0x38] sm:$0xff]  ;;  %v415_v18 = vpack.c.bf16 %v80_v13, %v79_v12  ;;  %v81_v19 = vld [vmem:[#allocation7 + $0x20] sm:$0xff]  ;;  %vm250_vm1 = vcmp.lt.s32.totalorder %v249_v57, 16 }
  0x3b   :  { %390 = vmatprep.subr.bf16.mxu0 %v547_v0  ;;  %v82_v20 = vld [vmem:[#allocation7 + $0x28] sm:$0xff]  ;;  %v397_v21 = vpack.c.bf16 %v68_v17, %v67_v16  ;;  %v69_v22 = vld [vmem:[#allocation5 + $0x40] sm:$0xff]  ;;  %v83_v25 = vld [vmem:[#allocation7 + $0x30] sm:$0xff] }
  0x3c   :  { %413 = vmatpush3.bf16.msra.mxu1 %v412_v15  ;;  %v70_v23 = vld [vmem:[#allocation5 + $0x48] sm:$0xff]  ;;  %v418_v24 = vpack.c.bf16 %v82_v20, %v81_v19  ;;  %v84_v26 = vld [vmem:[#allocation7 + $0x38] sm:$0xff]  ;;  %v71_v28 = vld [vmem:[#allocation5 + $0x50] sm:$0xff] }
  0x3d   :  { %414 = vmatprep.subr.bf16.mxu1 %v547_v0  ;;  %v400_v27 = vpack.c.bf16 %v70_v23, %v69_v22  ;;  %v72_v29 = vld [vmem:[#allocation5 + $0x58] sm:$0xff]  ;;  %v421_v30 = vpack.c.bf16 %v84_v26, %v83_v25  ;;  %v85_v31 = vld [vmem:[#allocation7 + $0x40] sm:$0xff]  ;;  %v86_v32 = vld [vmem:[#allocation7 + $0x48] sm:$0xff] }
  0x3e   :  { %392 = vmatpush3.bf16.msra.mxu0 %v391_v7  ;;  %v403_v33 = vpack.c.bf16 %v72_v29, %v71_v28  ;;  %v73_v34 = vld [vmem:[#allocation5 + $0x60] sm:$0xff]  ;;  %v74_v35 = vld [vmem:[#allocation5 + $0x68] sm:$0xff]  ;;  %v424_v36 = vpack.c.bf16 %v86_v32, %v85_v31  ;;  %v87_v37 = vld [vmem:[#allocation7 + $0x50] sm:$0xff] }
  0x3f   :  { %393 = vmatprep.subr.bf16.mxu0 %v547_v0  ;;  %v88_v38 = vld [vmem:[#allocation7 + $0x58] sm:$0xff]  ;;  %v406_v39 = vpack.c.bf16 %v74_v35, %v73_v34  ;;  %v75_v40 = vld [vmem:[#allocation5 + $0x70] sm:$0xff]  ;;  %v89_v43 = vld [vmem:[#allocation7 + $0x60] sm:$0xff] }
  0x40   :  { %416 = vmatpush3.bf16.msra.mxu1 %v415_v18  ;;  %v76_v41 = vld [vmem:[#allocation5 + $0x78] sm:$0xff]  ;;  %v427_v42 = vpack.c.bf16 %v88_v38, %v87_v37  ;;  %v90_v44 = vld [vmem:[#allocation7 + $0x68] sm:$0xff]  ;;  %v91_v48 = vld [vmem:[#allocation7 + $0x70] sm:$0xff] }
  0x41   :  { %417 = vmatprep.subr.bf16.mxu1 %v547_v0  ;;  %v409_v45 = vpack.c.bf16 %v76_v41, %v75_v40  ;;  %v430_v46 = vpack.c.bf16 %v90_v44, %v89_v43  ;;  %v60_v47 = vld [vmem:[#allocation2] sm:$0xff] }
  0x42   :  { %395 = vmatpush3.bf16.msra.mxu0 %v394_v14  ;;  %v92_v49 = vld [vmem:[#allocation7 + $0x78] sm:$0xff] }
  0x43   :  { %396 = vmatprep.subr.bf16.mxu0 %v547_v0  ;;  %v433_v50 = vpack.c.bf16 %v92_v49, %v91_v48  ;;  %v281_v51 = vld [vmem:[%s659_s2] ss:$0 sm:$0xff]  ;;  %s550_s2 = smov [#allocation8]  }
  0x44   :  { %419 = vmatpush3.bf16.msra.mxu1 %v418_v24  ;;  %v282_v58 = vld [vmem:[%s661_s4] ss:$0 sm:$0xff]  ;;  %s271_s7 = sshll.u32 %s550_s2, 4  ;;  %s272_s7 = int_to_ptr.vmem [resolvable:$true] %s271_s7 }
  0x45   :  { %420 = vmatprep.subr.bf16.mxu1 %v547_v0  ;;  %s514_s4 = scalar_lea.vmem %s272_s7, 128  ;;  %p519_p11 = scmp.lt.s32.totalorder %s272_s7, %s272_s7 }
  0x46   :  { %398 = vmatpush3.bf16.msra.mxu0 %v397_v21  ;;  %p515_p10 = scmp.ne.s32.totalorder %s272_s7, %s514_s4  ;;  %p520_p12 = scmp.lt.s32.totalorder %s514_s4, %s514_s4 }
  0x47   :  { %399 = vmatprep.subr.bf16.mxu0 %v547_v0 }
  0x48   :  { %422 = vmatpush3.bf16.msra.mxu1 %v421_v30  ;;  %p521_p13 = por %p520_p12, %p519_p11 }
  0x49   :  { %423 = vmatprep.subr.bf16.mxu1 %v547_v0 }
  0x4a   :  { %401 = vmatpush3.bf16.msra.mxu0 %v400_v27  ;;  %p522_p0 = pnand %p521_p13, %p515_p10 }
  0x4b   :  { %402 = vmatprep.subr.bf16.mxu0 %v547_v0 }
  0x4c   :  { %425 = vmatpush3.bf16.msra.mxu1 %v424_v36 }
  0x4d   :  { %426 = vmatprep.subr.bf16.mxu1 %v547_v0 }
  0x4e   :  { %404 = vmatpush3.bf16.msra.mxu0 %v403_v33 }
  0x4f   :  { %405 = vmatprep.subr.bf16.mxu0 %v547_v0 }
  0x50   :  { %428 = vmatpush3.bf16.msra.mxu1 %v427_v42 }
  0x51   :  { %429 = vmatprep.subr.bf16.mxu1 %v547_v0 }
  0x52   :  { %407 = vmatpush3.bf16.msra.mxu0 %v406_v39 }
  0x53   :  { %408 = vmatprep.subr.bf16.mxu0 %v547_v0 }
  0x54   :  { %431 = vmatpush3.bf16.msra.mxu1 %v430_v46 }
  0x55   :  { %432 = vmatprep.subr.bf16.mxu1 %v547_v0 }
  0x56   :  { %410 = vmatpush3.bf16.msra.mxu0 %v409_v45 }
  0x58   :  { %434 = vmatpush3.bf16.msra.mxu1 %v433_v50 }
  0x59   :  { %350 = vmatmul.mubr.f32.vlgmr.msra.gmra.mrb[0].mxu0 %v60_v47 }
 0x12c   :  { %v166_v52 = vpop.f32.mrb[0].mxu0 }
 0x12d   :  { %v167_v53 = vadd.f32 %v281_v51, %v166_v52  ;;  %v351_v54 = vpop.f32.mrb[1].mxu0 }
 0x12f   :  { %v170_v55 = vmax.f32 %v167_v53, 0.0 }
 0x131   :  { %385 = vmatmul.mubr.f32.vlgmr.msra.gmra.mrb[0].mxu1 %v170_v55 }
 0x204   :  { %v244_v59 = vpop.f32.mrb[0].mxu1 }
 0x205   :  { %v245_v60 = vadd.f32 %v282_v58, %v244_v59  ;;  %v386_v61 = vpop.f32.mrb[1].mxu1 }
 0x207   :  { %v251_v62 = vsel %vm250_vm1, %v245_v60, -1e+30 }
 0x208   :  { %252 = vmax.xlane.f32.xlu0 %v251_v62 }
 0x295   :  { %v253_v63 = vpop.xlane.xlu0 %252 }
 0x296   :  { %v254_v0 = vsub.f32 %v251_v62, %v253_v63 }
 0x298   :  { %v255_v1 = vmul.f32 1.442695, %v254_v0 }
 0x29a   :  { %444 = vpow2.f32 %v255_v1 }
 0x2a4   :  { %v445_v2 = vpop.eup %444 }
 0x2a5   :  { %257 = vadd.xlane.f32.xlu0 %v445_v2 }
 0x332   :  { %v258_v3 = vpop.xlane.xlu0 %257 }
 0x333   :  { %446 = vrcp.f32 %v258_v3 }
 0x33d   :  { %v447_v4 = vpop.eup %446 }
 0x33e   :  { %v260_v5 = vmul.f32 %v447_v4, %v258_v3 }
 0x340   :  { %v261_v6 = vsub.f32 2.0, %v260_v5 }
 0x342   :  { %v262_v7 = vmul.f32 %v447_v4, %v261_v6 }
 0x344   :  { %v263_v8 = vmul.f32 %v445_v2, %v262_v7 }
 0x346   :  { %264 = vst [vmem:[#allocation8] sm:$0xff] %v263_v8 }
 0x347   :  { %525 = shalt.err (!%p522_p0)
}
 0x348   :  { %s526_s10 = scalar_lea.hbm %s662_s5, 128 }
 0x349   :  { %p527_p1 = scmp.ne.s32.totalorder %s662_s5, %s526_s10  ;;  %p530_p2 = scmp.lt.u32.totalorder %s526_s10, %s662_s5 }
 0x34b   :  { %p532_p3 = pnand %p530_p2, %p527_p1 }
 0x34d   :  { %535 = shalt.err (!%p532_p3)
}
 0x34e   :  { %274 = dma.vmem_to_hbm [thread:$0]  %s272_s7, 128, %s662_s5, [#allocation4]  }
 0x34f   :  { %540 = dma.done.wait [#allocation4], 128  }
 0x350   :  { %541 = vsyncadd [#allocation4], 4294967168 }
 0x351   :  { %278 = vsyncpa [#allocation3], 1 }
 0x352   :  { %279 = vsyncpa [#allocation6], 1 }
 0x353   :  { %280 = vsyncpa [#allocation4], 1 }

</bundles_post_ra>
